<compile_context>
chip_gen: v7x
topology: tpu7x:2x2x1
jax: 0.10.0
libtpu: 0.0.40
codegen_flags: <defaults>
</compile_context>

<pallas_src>
import math
import functools

import jax
import jax.numpy as jnp
from jax import lax
from jax.experimental import pallas as pl
from jax.experimental.pallas import tpu as pltpu


def make_positional_encoding(seq_len: int, d_model: int) -> jnp.ndarray:
    """Deterministic sin/cos positional-encoding table, shape (seq_len, d_model)."""
    position = jnp.arange(seq_len, dtype=jnp.float32)[:, None]          # (S, 1)
    div_term = jnp.exp(jnp.arange(0, d_model, 2, dtype=jnp.float32)
                       * (-math.log(10000.0) / d_model))                # (D/2,)
    pe = jnp.zeros((seq_len, d_model), dtype=jnp.float32)
    pe = pe.at[:, 0::2].set(jnp.sin(position * div_term))
    pe = pe.at[:, 1::2].set(jnp.cos(position * div_term))
    return pe


def prepare_pe_flat(pe_table: jnp.ndarray, seq_len: int, dtype) -> jnp.ndarray:
    """Slice/cast/flatten the PE table once per (seq_len, dtype); cache at the call site."""
    d_model = pe_table.shape[-1]
    # NOTE: cast-to-input-dtype before the add (bf16 inputs add a bf16-rounded table,
    # which differs slightly from an f32 add followed by a downcast).
    return pe_table[:seq_len, :].astype(dtype).reshape(1, seq_len * d_model)


# ---------------------------------------------------------------------------
# Kernels (flattened lane-dense layout: x block (TB, TN), pe block (1, TN))
# ---------------------------------------------------------------------------
def pe_add_kernel(x_ref, pe_ref, o_ref):
    # Broadcast-add the (1, TN) PE row over the (TB, TN) batch-row block.
    o_ref[...] = x_ref[...] + pe_ref[...]


def _fmix32(h):
    """murmur3 finalizer; uint32 in, well-mixed uint32 out (pure VPU int ops)."""
    h = h ^ (h >> jnp.uint32(16))
    h = h * jnp.uint32(0x85EBCA6B)
    h = h ^ (h >> jnp.uint32(13))
    h = h * jnp.uint32(0xC2B2AE35)
    h = h ^ (h >> jnp.uint32(16))
    return h


def pe_add_dropout_kernel(seed_ref, x_ref, pe_ref, o_ref, *, p, n_total):
    # Training-mode (inverted) dropout applied to (x + PE).
    # Stateless counter-based RNG: hash(global element index, seed).  Tiling-invariant,
    # works on TPU and the interpret backend (no hardware-PRNG primitives).
    # TODO(synk): does not reproduce torch's nn.Dropout RNG stream bit-for-bit.
    TB, TN = x_ref.shape
    c = pl.program_id(0)                      # column-tile index (outer)
    b = pl.program_id(1)                      # row-tile index (inner / fastest)
    row0 = (b * TB).astype(jnp.uint32)
    col0 = (c * TN).astype(jnp.uint32)

    rows = lax.broadcasted_iota(jnp.uint32, (TB, TN), 0)
    cols = lax.broadcasted_iota(jnp.uint32, (TB, TN), 1)
    lin = (rows + row0) * jnp.uint32(n_total) + (cols + col0)   # wraps mod 2^32 (fine)

    seed_u = seed_ref[0].astype(jnp.uint32)
    h = _fmix32(lin ^ (seed_u * jnp.uint32(0x9E3779B9)))

    # Integer-domain threshold: keep iff low-24 uniform bits >= p * 2^24.
    # (keep-probability is quantized to 1/2^24; negligible bias, documented.)
    r = (h & jnp.uint32(0x00FFFFFF)).astype(jnp.int32)
    thresh = jnp.int32(min(int(round(p * float(1 << 24))), (1 << 24) - 1))
    keep = r >= thresh                         # P(keep) = 1 - p

    y = x_ref[...] + pe_ref[...]
    scale = jnp.asarray(1.0 / (1.0 - p), dtype=y.dtype)   # stay in input dtype (v5e)
    o_ref[...] = jnp.where(keep, y * scale, jnp.zeros_like(y))


# ---------------------------------------------------------------------------
# Tiling + wrapper
# ---------------------------------------------------------------------------
def _sublane_tile(itemsize: int) -> int:
    # Native sublane tile: (8,128) f32, (16,128) bf16, (32,128) int8/fp8.
    return {8: 4, 4: 8, 2: 16, 1: 32}.get(itemsize, 8)


def _choose_tiles(B, N, itemsize, target_bytes=2 << 20):
    """Pick (row, lane) block sizes.  N must already be a multiple of 128.

    Lanes are a large multiple of 128 (unmasked full-width stores), rows are rounded to
    the dtype's native sublane tile, block ~2 MiB so the double-buffered working set
    fits the 16 MiB scoped-VMEM default on v5e (and comfortably on v6e/v7x)."""
    sub = _sublane_tile(itemsize)
    max_lanes = max(128, ((target_bytes // itemsize) // sub) // 128 * 128)
    tn = min(N, max_lanes)
    rows_budget = max(1, target_bytes // max(1, tn * itemsize))
    if B <= rows_budget or B <= sub:
        tb = B                                  # full batch dim is always legal
    else:
        tb = max(sub, (rows_budget // sub) * sub)
    # v7x megacore: make sure there are >= 2 parallel tiles whenever possible so the
    # second TensorCore has work (this kernel is purely HBM-bandwidth bound).
    if pl.cdiv(N, tn) * pl.cdiv(B, tb) < 2:
        if B >= 2 * sub:
            tb = max(sub, ((B // 2) // sub) * sub)
        elif N >= 2 * 128:
            tn = max(128, ((N // 2) // 128) * 128)
    return tb, tn


def positional_encoding_forward(x, pe_table=None, *, pe_flat=None,
                                dropout_p=0.0, training=False, seed=0):
    """x: (B, S, D).  Pass either pe_table (seq_len>=S, D) or a cached pe_flat (1, S*D)."""
    B, S, D = x.shape
    N = S * D

    if training and dropout_p >= 1.0:           # guard: scale would be inf
        return jnp.zeros_like(x)

    if pe_flat is None:
        pe_flat = prepare_pe_flat(pe_table, S, x.dtype)
    pe2 = pe_flat.astype(x.dtype)

    # Lane-dense 2D views (layout plumbing only; reshape of a contiguous array is a bitcast).
    # TODO(synk): if x can arrive non-contiguous, switch to a 3-D BlockSpec instead.
    x2 = x.reshape(B, N)

    # Pad the lane axis to a multiple of 128 so tiles stay lane-dense and VMEM-bounded.
    N_pad = ((N + 127) // 128) * 128
    if N_pad != N:
        x2 = jnp.pad(x2, ((0, 0), (0, N_pad - N)))
        pe2 = jnp.pad(pe2, ((0, 0), (0, N_pad - N)))

    itemsize = jnp.dtype(x.dtype).itemsize
    tb, tn = _choose_tiles(B, N_pad, itemsize)
    grid = (pl.cdiv(N_pad, tn), pl.cdiv(B, tb))  # columns outer, rows inner (fastest)

    out_shape = jax.ShapeDtypeStruct((B, N_pad), x.dtype)
    cparams = pltpu.CompilerParams(dimension_semantics=("parallel", "parallel"))
    cost = pl.CostEstimate(flops=2 * B * N_pad, transcendentals=0,
                           bytes_accessed=(2 * B * N_pad + N_pad) * itemsize)

    if training and dropout_p > 0.0:
        # index_maps receive the scalar-prefetch ref as a trailing positional arg.
        x_spec = pl.BlockSpec((tb, tn), lambda c, b, sd: (b, c))
        pe_spec = pl.BlockSpec((1, tn), lambda c, b, sd: (0, c))   # constant over b
        o_spec = pl.BlockSpec((tb, tn), lambda c, b, sd: (b, c))
        seed_arr = jnp.array([seed], dtype=jnp.int32)
        out2 = pl.pallas_call(
            functools.partial(pe_add_dropout_kernel, p=float(dropout_p), n_total=N_pad),
            out_shape=out_shape,
            grid_spec=pltpu.PrefetchScalarGridSpec(
                num_scalar_prefetch=1, grid=grid,
                in_specs=[x_spec, pe_spec], out_specs=o_spec),
            compiler_params=cparams,
            cost_estimate=cost,
        )(seed_arr, x2, pe2)
    else:
        x_spec = pl.BlockSpec((tb, tn), lambda c, b: (b, c))
        pe_spec = pl.BlockSpec((1, tn), lambda c, b: (0, c))       # constant over b
        o_spec = pl.BlockSpec((tb, tn), lambda c, b: (b, c))
        out2 = pl.pallas_call(
            pe_add_kernel,
            out_shape=out_shape,
            grid_spec=pltpu.PrefetchScalarGridSpec(
                num_scalar_prefetch=0, grid=grid,
                in_specs=[x_spec, pe_spec], out_specs=o_spec),
            compiler_params=cparams,
            cost_estimate=cost,
        )(x2, pe2)

    if N_pad != N:
        out2 = out2[:, :N]
    return out2.reshape(B, S, D)


if __name__ == "__main__":
    # Module config (small, deterministic): batch=2, seq=8, hidden=32
    d_model = 32
    seq_len = 8
    dropout_p = 0.1

    key = jax.random.PRNGKey(0)
    x = jax.random.normal(key, (2, seq_len, d_model), dtype=jnp.float32)
    pe_table = make_positional_encoding(seq_len, d_model)
    pe_flat = prepare_pe_flat(pe_table, seq_len, x.dtype)   # hoisted / cacheable

    # Eval-mode forward (dropout is identity) -> exact reference check.
    out = positional_encoding_forward(x, pe_flat=pe_flat,
                                      dropout_p=dropout_p, training=False)
    out = jax.block_until_ready(out)
    ref = x + pe_table[None, :seq_len, :]
    assert out.shape == x.shape and out.dtype == x.dtype
    assert jnp.allclose(out, ref, atol=1e-6), "eval-mode mismatch vs reference"

    # Training-mode forward: every element is either 0 (dropped) or ref/(1-p) (kept).
    out_tr = positional_encoding_forward(x, pe_flat=pe_flat, dropout_p=dropout_p,
                                         training=True, seed=0)
    out_tr = jax.block_until_ready(out_tr)
    scale = 1.0 / (1.0 - dropout_p)
    ok = jnp.isclose(out_tr, ref * scale, atol=1e-5) | jnp.isclose(out_tr, 0.0, atol=1e-7)
    assert out_tr.shape == x.shape and bool(jnp.all(ok)), "dropout-mode mismatch"
    assert bool(jnp.any(out_tr != 0.0)), "dropout dropped everything (hash bug?)"

    print("KERNEL_OK")
</pallas_src>

<mosaic_0001>
module attributes {stable_mosaic.version = 11 : i64} {
  func.func @pe_add_kernel(%arg0: i32, %arg1: i32, %arg2: memref<2x128xf32, #tpu.memory_space<vmem>>, %arg3: memref<1x128xf32, #tpu.memory_space<vmem>>, %arg4: memref<2x128xf32, #tpu.memory_space<vmem>>) attributes {dimension_semantics = [#tpu.dimension_semantics<parallel>, #tpu.dimension_semantics<parallel>], iteration_bounds = array<i64: 2, 1>, scalar_prefetch = 0 : i64, scratch_operands = 0 : i64, tpu.core_type = #tpu.core_type<tc>, window_params = [{transform_indices = @transform_0, window_bounds = array<i64: 2, 128>}, {transform_indices = @transform_1, window_bounds = array<i64: 1, 128>}, {transform_indices = @transform_2, window_bounds = array<i64: 2, 128>}]} {
    %c0 = arith.constant 0 : index
    %c0_0 = arith.constant 0 : index
    %0 = vector.load %arg2[%c0, %c0_0] : memref<2x128xf32, #tpu.memory_space<vmem>>, vector<2x128xf32>
    %c0_1 = arith.constant 0 : index
    %c0_2 = arith.constant 0 : index
    %1 = vector.load %arg3[%c0_1, %c0_2] : memref<1x128xf32, #tpu.memory_space<vmem>>, vector<1x128xf32>
    %2 = vector.broadcast %1 : vector<1x128xf32> to vector<2x128xf32>
    %3 = arith.addf %0, %2 : vector<2x128xf32>
    %c0_3 = arith.constant 0 : index
    %c0_4 = arith.constant 0 : index
    %4 = vector.load %arg4[%c0_3, %c0_4] : memref<2x128xf32, #tpu.memory_space<vmem>>, vector<2x128xf32>
    tpu.vector_store %arg4[%c0_3, %c0_4], %3 {strides = array<i32>} : memref<2x128xf32, #tpu.memory_space<vmem>>, vector<2x128xf32>,
    return
  }
  func.func @transform_0(%arg0: i32, %arg1: i32) -> (i32, i32) {
    %c0_i32 = arith.constant 0 : i32
    return %arg1, %arg0 : i32, i32
  }
  func.func @transform_1(%arg0: i32, %arg1: i32) -> (i32, i32) {
    %c0_i32 = arith.constant 0 : i32
    %c0_i32_0 = arith.constant 0 : i32
    return %c0_i32, %arg0 : i32, i32
  }
  func.func @transform_2(%arg0: i32, %arg1: i32) -> (i32, i32) {
    %c0_i32 = arith.constant 0 : i32
    return %arg1, %arg0 : i32, i32
  }
}

</mosaic_0001>

<bundles_post_ra>
// kernel: tpu_custom_call.1
= control target key start
LH: loop header
LB: loop body
LE: loop exit
PB: predicated region body
PF: predicated region fallthrough
CT: control target
= control target key end

     0   :  { %7 = vsyncpa [#allocation3], 0  ;;  %s692_s0 = inlined_call_operand.hbm [shape: f32[2,256], index: 0, kind: input, shape index: {}]   ;;  %s693_s1 = inlined_call_operand.vmem [shape: f32[1,256], index: 1, kind: input, shape index: {}]   ;;  %s694_s2 = inlined_call_operand.hbm [shape: f32[2,256], index: 2, kind: output, shape index: {}]  }
   0x1   :  { %9 = vsyncpa [#allocation3 + $0x1], 0 }
   0x2   :  { %10 = vsyncpa [#allocation4], 0 }
   0x3   :  { %12 = vsyncpa [#allocation4 + $0x1], 0  ;;  %s515_s9 = smov 0   ;;  %s517_s10 = smov 0  }
   0x4   :  { %s519_s11 = smov 0   ;;  %s521_s12 = smov 0  }
   0x5   :  { %s523_s13 = smov 0   ;;  %s525_s14 = smov 0  }
   0x6 LB: > { %s308_s15 = sadd.s32 4294967295, %s496_s14   ;;  %s309_s16 = sadd.s32 4294967294, %s496_s14   ;;  %s496_s14 = sphi %s525_s14, %s18_s14   ;;  %s492_s13 = sphi %s523_s13, %s710_s13   ;;  %s488_s12 = sphi %s521_s12, %s709_s12   ;;  %s484_s11 = sphi %s519_s11, %s708_s11   ;;  %s480_s10 = sphi %s517_s10, %s707_s10   ;;  %s476_s9 = sphi %s515_s9, %s706_s9  }
   0x7   : > { %s30_s17 = sadd.s32 1, %s492_s13  ;;  %s39_s18 = sadd.s32 1, %s484_s11 }
   0x8   : > { %p32_p0 = scmp.ge.s32.totalorder %s30_s17, 2  ;;  %p46_p1 = scmp.ne.s32.totalorder %s484_s11, %s480_s10 }
   0x9   : > { %p47_p2 = scmp.eq.s32.totalorder %s496_s14, 0  ;;  %p52_p3 = scmp.ne.s32.totalorder %s480_s10, %s476_s9 }
   0xa   : > { %s712_s17 = smov (%p32_p0, %s30_s17), 0  ;;  %p53_p5 = scmp.eq.s32.totalorder %s308_s15, 0 }
   0xb   : > { %p556_p4 = por %p47_p2, %p46_p1  ;;  %s35_s20 = ssub.s32 %s492_s13, %s712_s17 }
   0xc   : > { %p104_p6 = scmp.eq.s32.totalorder %s308_s15, 1  ;;  %p37_p7 = scmp.eq.s32.totalorder %s35_s20, 0 }
   0xd   : > { %p562_p8 = por %p53_p5, %p52_p3  ;;  %p110_p10 = scmp.eq.s32.totalorder %s309_s16, 1 }
   0xe   : > { %p566_p9 = por %p104_p6, %p46_p1  ;;  %p334_p13 = scmp.lt.s32.totalorder %s496_s14, 2 }
   0xf   : > { %s571_s23 = scalar_select %p37_p7, %s484_s11, %s39_s18  }
  0x10   : > { %s698_s22 = scalar_select %p566_p9, 1, 0 }
  0x11   : > { %p573_p11 = por %p110_p10, %p52_p3  ;;  %s130_s25 = sand.u32 1, %s484_s11  }
  0x12   : > { %s312_s26 = sshll.u32 %s130_s25, 1  ;;  %s313_s27 = sshll.u32 %s492_s13, 5 }
  0x13   : > { %s699_s24 = scalar_select %p573_p11, 1, 0 }
  0x14   : > { %s584_s30 = scalar_lea.hbm %s692_s0, %s313_s27  ;;  %s134_s3 = scalar_lea.vmem [#allocation2], %s312_s26 }
  0x15   : > { %s143_s4 = sshll.u32 %s134_s3, 4  ;;  %p590_p0 = pnand %p334_p13, %p556_p4  ;;  %s586_s4 = int_to_ptr.vmem [resolvable:$true] %s143_s4 }
  0x16   : > { %s131_s6 = scalar_lea.sflag [#allocation3], %s130_s25  ;;  %s384_s7 = scalar_lea.hbm %s584_s30, 32 }
  0x17   : > { %p385_p3 = scmp.ne.s32.totalorder %s584_s30, %s384_s7  ;;  %p386_p5 = pneg %p590_p0 }
  0x18   : > { %s389_s16 = scalar_lea.hbm %s692_s0, 64  ;;  %p390_p4 = scmp.lt.u32.totalorder %s584_s30, %s692_s0 }
  0x19   : > { %p387_p6 = pnand %p386_p5, %p385_p3  ;;  %p391_p10 = scmp.lt.u32.totalorder %s389_s16, %s384_s7 }
  0x1a   : > { %p393_p12 = scmp.lt.u32.totalorder %s384_s7, %s584_s30 }
  0x1b   : > { %p388_p7 = pneg %p387_p6  ;;  %p392_p13 = por %p391_p10, %p390_p4 }
  0x1d   : > { %p394_p1 = por %p393_p12, %p392_p13 }
  0x1f   : > { %p395_p2 = pnand %p394_p1, %p388_p7 }
  0x21   : > { %398 = shalt.err (!%p395_p2)
}
  0x22   : > { %s399_s20 = scalar_lea.vmem %s586_s4, 32  ;;  %s498_s25 = smov [#allocation2]  }
  0x23   : > { %p400_p3 = scmp.ne.s32.totalorder %s586_s4, %s399_s20  ;;  %s404_s26 = sshll.u32 %s498_s25, 4  ;;  %s405_s26 = int_to_ptr.vmem [resolvable:$false] %s404_s26 }
  0x24   : > { %s406_s27 = scalar_lea.vmem %s405_s26, 64  ;;  %p407_p9 = scmp.lt.s32.totalorder %s586_s4, %s405_s26 }
  0x25   : > { %p402_p6 = pnand %p400_p3, %p386_p5  ;;  %p408_p4 = scmp.lt.s32.totalorder %s406_s27, %s399_s20 }
  0x27   : > { %p403_p11 = pneg %p402_p6  ;;  %p409_p10 = por %p408_p4, %p407_p9 }
  0x29   : > { %p410_p12 = pnand %p409_p10, %p403_p11 }
  0x2b   : > { %413 = shalt.err (!%p410_p12)
}
  0x2c   : > { %329 = dma.hbm_to_vmem [thread:$0]  (!%p590_p0), %s584_s30, 32, %s586_s4, %s131_s6  }
  0x2d   : > { %p701_p1 = scmp.lt.s32.totalorder %s496_s14, 3  ;;  %p702_p2 = scmp.ge.s32.totalorder %s496_s14, 1 }
  0x2f   : > { %p155_p5 = pnand %p702_p2, %p701_p1 }
  0x30   : > { %s626_s28 = sand.u32 (!%p155_p5), 1, %s480_s10  }
  0x31   : > { %158 = sbr.rel (%p155_p5) target bundleno = 85 (0x55), region = 28  ;;  %s315_s29 = sshll.u32 (!%p155_p5), %s626_s28, 1 }
  0x32   : > { %s161_s3 = scalar_lea.sflag (!%p155_p5), [#allocation3], %s626_s28  ;;  %s164_s7 = scalar_lea.vmem (!%p155_p5), [#allocation2], %s315_s29 }
  0x38   : > { %467 = dma.done.wait (%p562_p8), %s161_s3, 32  }
  0x39   : > { %469 = vsyncadd (%p562_p8), %s161_s3, 4294967264  ;;  %p188_p9 = scmp.lt.s32.totalorder %s488_s12, 1  ;;  %s187_s8 = scalar_lea.vmem [#allocation5], %s315_s29  ;;  %v191_v0 = vld [vmem:[%s164_s7] sm:$0x3] }
  0x3a   : > { %s217_s15 = sshll.u32 %s187_s8, 4  ;;  %s319_s16 = sshll.u32 %s488_s12, 5  ;;  %s640_s15 = int_to_ptr.vmem [resolvable:$true] %s217_s15 }
  0x3b   : > { %s189_s30 = scalar_select %p188_p9, %s488_s12, 1 }
  0x3c   : > { %s645_s19 = scalar_lea.hbm %s694_s2, %s319_s16  ;;  %s202_s20 = scalar_lea.sflag [#allocation4], %s626_s28 }
  0x3d   : > { %s190_s6 = scalar_lea.vmem %s693_s1, %s189_s30  ;;  %s414_s25 = scalar_lea.vmem %s640_s15, 32 }
  0x3e   : > { %v317_v1 = vld [vmem:[%s190_s6] ss:$0 sm:$0xff]  ;;  %p415_p8 = scmp.ne.s32.totalorder %s640_s15, %s414_s25  ;;  %p703_p11 = scmp.ne.s32.totalorder %s698_s22, 0 }
  0x3f   : > { %v199_v2 = vadd.f32 %v317_v1, %v191_v0  ;;  %s499_s12 = smov [#allocation5]  }
  0x40   : > { %p416_p0 = pnand %p415_p8, %p703_p11  ;;  %s418_s26 = sshll.u32 %s499_s12, 4  ;;  %s419_s26 = int_to_ptr.vmem [resolvable:$false] %s418_s26 }
  0x41   : > { %200 = vst [vmem:[%s187_s8] sm:$0x3] %v199_v2  ;;  %s420_s27 = scalar_lea.vmem %s419_s26, 64  ;;  %p421_p13 = scmp.lt.s32.totalorder %s640_s15, %s419_s26 }
  0x42   : > { %p417_p7 = pneg %p416_p0  ;;  %p422_p3 = scmp.lt.s32.totalorder %s420_s27, %s414_s25 }
  0x44   : > { %p423_p6 = por %p422_p3, %p421_p13 }
  0x46   : > { %p424_p4 = pnand %p423_p6, %p417_p7 }
  0x48   : > { %427 = shalt.err (!%p424_p4)
}
  0x49   : > { %s428_s28 = scalar_lea.hbm %s645_s19, 32  ;;  %s432_s7 = scalar_lea.hbm %s694_s2, 64 }
  0x4a   : > { %p429_p10 = scmp.ne.s32.totalorder %s645_s19, %s428_s28  ;;  %p433_p2 = scmp.lt.u32.totalorder %s645_s19, %s694_s2 }
  0x4b   : > { %p434_p5 = scmp.lt.u32.totalorder %s432_s7, %s428_s28  ;;  %p436_p8 = scmp.lt.u32.totalorder %s428_s28, %s645_s19 }
  0x4c   : > { %p430_p12 = pnand %p429_p10, %p703_p11 }
  0x4d   : > { %p435_p9 = por %p434_p5, %p433_p2 }
  0x4e   : > { %p431_p1 = pneg %p430_p12 }
  0x4f   : > { %p437_p0 = por %p436_p8, %p435_p9 }
  0x51   : > { %p438_p7 = pnand %p437_p0, %p431_p1 }
  0x53   : > { %441 = shalt.err (!%p438_p7)
}
  0x54   : > { %324 = dma.vmem_to_hbm [thread:$0]  (%p703_p11), %s640_s15, 32, %s645_s19, %s202_s20  }
  0x55 PF: > { %s229_s5 = sand.u32 1, %s476_s9   ;;  %p704_p13 = scmp.ne.s32.totalorder %s699_s24, 0 }
  0x56   : > { %p705_p3 = scmp.ge.s32.totalorder %s496_s14, 2  ;;  %s230_s6 = scalar_lea.sflag [#allocation4], %s229_s5 }
  0x58   : > { %p331_p6 = pnand %p705_p3, %p704_p13 }
  0x5a   : > { %471 = dma.done.wait (!%p331_p6), %s230_s6, 32  }
  0x5b   : > { %473 = vsyncadd (!%p331_p6), %s230_s6, 4294967264  ;;  %s18_s14 = sadd.s32 1, %s496_s14   ;;  %s706_s9 = smov %s480_s10 }
  0x5c   : > { %p15_p4 = scmp.ge.s32.totalorder %s18_s14, 4   ;;  %s707_s10 = smov %s484_s11 }
  0x5d   : > { %s708_s11 = smov %s571_s23  ;;  %s709_s12 = smov %s492_s13 }
  0x5e   : > { %s710_s13 = smov %s712_s17  ;;  %17 = sbr.rel (!%p15_p4) target bundleno = 6 (0x6), region = 76 }
  0x65   :  { %235 = vsyncpa [#allocation3], 1 }
  0x66   :  { %237 = vsyncpa [#allocation3 + $0x1], 1 }
  0x67   :  { %238 = vsyncpa [#allocation4], 1 }
  0x68   :  { %240 = vsyncpa [#allocation4 + $0x1], 1 }

</bundles_post_ra>
